<compile_context>
chip_gen: v7x
topology: tpu7x:2x2x1
jax: 0.10.0
libtpu: 0.0.40
codegen_flags: <defaults>
</compile_context>

<pallas_src>
import jax
import jax.numpy as jnp
from jax import lax
from jax.experimental import pallas as pl
from jax.experimental.pallas import tpu as pltpu

_LANES = 128
_SUBLANES = 8          # f32 sublane count; sub-32-bit dtypes pack more rows/vreg
_NUM_SPLITS = 2        # leading "parallel" grid axis; shards across v7x's 2 TCs


def _round_up(x, m):
    return ((x + m - 1) // m) * m


def _cdiv(a, b):
    return (a + b - 1) // b


def _per_buffer_cap_bytes():
    """Per-input VMEM tile cap, generation aware.

    v5e / v6e have 128 MiB physical VMEM -> 8 MiB per input buffer
    (3 inputs x 2 pipeline buffers = 48 MiB working set).
    v7x has only 64 MiB -> 4 MiB per buffer (24 MiB working set).
    """
    try:
        vmem = pltpu.get_tpu_info().vmem_capacity_bytes
    except Exception:   # conservative fallback if introspection is unavailable
        vmem = 0
    return (8 << 20) if vmem >= (100 << 20) else (4 << 20)


def _jax_sumsq(p, g, h):
    v = h.astype(jnp.float32) * (p.astype(jnp.float32) - g.astype(jnp.float32))
    return jnp.sum(v * v)


def _make_kernel(tile_rows, valid_rows, blocks_per_split, full_blocks, has_partial):
    """Per-block weighted sum-of-squares accumulated into a resident (8,128) slab."""

    def _sq(p_ref, g_ref, h_ref):
        d = p_ref[...].astype(jnp.float32) - g_ref[...].astype(jnp.float32)
        v = h_ref[...].astype(jnp.float32) * d
        return v * v

    def _fold(sq):
        # (tile_rows, 128) -> (8, 128) using pure VPU adds (no cross-lane work).
        return jnp.sum(sq.reshape(tile_rows // _SUBLANES, _SUBLANES, _LANES), axis=0)

    def kernel(p_ref, g_ref, h_ref, out_ref):
        c = pl.program_id(0)
        i = pl.program_id(1)
        gb = c * blocks_per_split + i        # global row-block index

        @pl.when(i == 0)
        def _init():
            out_ref[...] = jnp.zeros_like(out_ref)

        # Fast path: fully-valid blocks, no masking work at all.
        @pl.when(gb < full_blocks)
        def _full():
            out_ref[...] += _fold(_sq(p_ref, g_ref, h_ref))

        if has_partial:
            # Exactly one (the last real) block is partial; mask its tail rows.
            # Keep the mask applied to `sq` (post-square, select not combine) so
            # undefined rows of the edge block never reach the accumulator.
            @pl.when(gb == full_blocks)
            def _partial():
                sq = _sq(p_ref, g_ref, h_ref)
                row_ids = gb * tile_rows + lax.broadcasted_iota(
                    jnp.int32, (tile_rows, _LANES), 0)
                sq = jnp.where(row_ids < valid_rows, sq, 0.0)
                out_ref[...] += _fold(sq)

        # Blocks with gb > full_blocks (clamped "ghost" iterations) are skipped.

    return kernel


def locationmap_loss(pred_loc, gt_loc, gt_h):
    """Computes ||gt_h * (pred_loc - gt_loc)||_2 (scalar, float32)."""
    assert pred_loc.shape == gt_loc.shape == gt_h.shape, (
        "broadcast shapes not supported in this kernel; pre-broadcast in JAX")

    p = jnp.ravel(pred_loc)
    g = jnp.ravel(gt_loc)
    h = jnp.ravel(gt_h)
    total = p.size

    itemsize = max(jnp.dtype(a.dtype).itemsize for a in (pred_loc, gt_loc, gt_h))
    mult = max(_SUBLANES, 32 // itemsize)   # sublane multiple: 8 f32, 16 bf16, 32 i8

    main = (total // _LANES) * _LANES       # 128-aligned prefix handled by kernel
    rows = main // _LANES

    if rows < _NUM_SPLITS * mult:
        # Tiny input: kernel-launch overhead dominates; compute in plain JAX.
        return jnp.sqrt(_jax_sumsq(p, g, h))

    # Ragged tail (< 128 elems) summed in plain JAX; no jnp.pad of the inputs.
    if main != total:
        # TODO(synk): the [:main] slice still costs one XLA copy of the slab; an
        # in-kernel lane mask on the final block would avoid it entirely.
        tail_ss = _jax_sumsq(p[main:], g[main:], h[main:])
        p, g, h = p[:main], g[:main], h[:main]
    else:
        tail_ss = jnp.float32(0.0)

    p2 = p.reshape(rows, _LANES)
    g2 = g.reshape(rows, _LANES)
    h2 = h.reshape(rows, _LANES)

    # --- Tiling: balanced across splits, generation-aware, mult-aligned -----
    cap_rows = max(mult,
                   (_per_buffer_cap_bytes() // (_LANES * itemsize)) // mult * mult)
    splits = _NUM_SPLITS
    blocks_per_split = _cdiv(rows, splits * cap_rows)
    planned_blocks = splits * blocks_per_split
    tile_rows = _round_up(_cdiv(rows, planned_blocks), mult)   # <= cap_rows, <= rows
    actual_blocks = _cdiv(rows, tile_rows)                     # normally == planned
    last_block = actual_blocks - 1
    full_blocks = rows // tile_rows
    has_partial = (rows % tile_rows) != 0

    def in_map(c, i):
        # Clamp so any "ghost" iterations (planned > actual) stay in bounds;
        # their compute is skipped inside the kernel.
        return (jnp.minimum(c * blocks_per_split + i, last_block), 0)

    tile_spec = pl.BlockSpec((tile_rows, _LANES), in_map)
    # Per-split resident partial accumulator; lane-dense (8,128) f32 block.
    out_spec = pl.BlockSpec((None, _SUBLANES, _LANES), lambda c, i: (c, 0, 0))

    in_bytes = sum(tile_rows * _LANES * jnp.dtype(a.dtype).itemsize
                   for a in (p2, g2, h2))
    vmem_limit = 2 * in_bytes + splits * _SUBLANES * _LANES * 4 + (4 << 20)

    partials = pl.pallas_call(
        _make_kernel(tile_rows, rows, blocks_per_split, full_blocks, has_partial),
        out_shape=jax.ShapeDtypeStruct((splits, _SUBLANES, _LANES), jnp.float32),
        grid_spec=pltpu.PrefetchScalarGridSpec(
            num_scalar_prefetch=0,
            grid=(splits, blocks_per_split),
            in_specs=[tile_spec, tile_spec, tile_spec],
            out_specs=out_spec,
        ),
        compiler_params=pltpu.CompilerParams(
            # Leading axis shards across TensorCores on v7x; the reduction axis
            # stays sequential so the resident accumulation is valid.
            dimension_semantics=("parallel", "arbitrary"),
            vmem_limit_bytes=vmem_limit,
        ),
        # TODO(synk): sweep pipeline_mode=pl.Buffered(3) on the input specs for v7x.
    )(p2, g2, h2)

    return jnp.sqrt(jnp.sum(partials) + tail_ss)


if __name__ == "__main__":
    key = jax.random.PRNGKey(0)
    k1, k2, k3 = jax.random.split(key, 3)

    # Small shapes consistent with a location-map head: (batch, channels, H, W)
    shape = (2, 4, 16, 16)
    pred_Loc = jax.random.normal(k1, shape, dtype=jnp.float32)
    gt_Loc = jax.random.normal(k2, shape, dtype=jnp.float32)
    gt_H = jax.random.uniform(k3, shape, dtype=jnp.float32)

    loss = locationmap_loss(pred_Loc, gt_Loc, gt_H)
    loss = jax.block_until_ready(loss)

    # Reference check (plain JAX)
    ref = jnp.sqrt(jnp.sum((gt_H * (pred_Loc - gt_Loc)) ** 2))
    assert jnp.allclose(loss, ref, rtol=1e-5, atol=1e-5), (loss, ref)

    print("KERNEL_OK")
</pallas_src>

<mosaic_0001>
module attributes {stable_mosaic.version = 11 : i64} {
  func.func @kernel(%arg0: i32, %arg1: i32, %arg2: memref<8x128xf32, #tpu.memory_space<vmem>>, %arg3: memref<8x128xf32, #tpu.memory_space<vmem>>, %arg4: memref<8x128xf32, #tpu.memory_space<vmem>>, %arg5: memref<1x8x128xf32, #tpu.memory_space<vmem>>) attributes {dimension_semantics = [#tpu.dimension_semantics<parallel>, #tpu.dimension_semantics<arbitrary>], iteration_bounds = array<i64: 2, 1>, scalar_prefetch = 0 : i64, scratch_operands = 0 : i64, tpu.core_type = #tpu.core_type<tc>, window_params = [{transform_indices = @transform_0, window_bounds = array<i64: 8, 128>}, {transform_indices = @transform_1, window_bounds = array<i64: 8, 128>}, {transform_indices = @transform_2, window_bounds = array<i64: 8, 128>}, {transform_indices = @transform_3, window_bounds = array<i64: 1, 8, 128>}]} {
    %c1_i32 = arith.constant 1 : i32
    %0 = arith.muli %arg0, %c1_i32 : i32
    %1 = arith.addi %0, %arg1 : i32
    %c0_i32 = arith.constant 0 : i32
    %2 = arith.cmpi eq, %arg1, %c0_i32 : i32
    %3 = arith.extui %2 : i1 to i32
    %c0_i32_0 = arith.constant 0 : i32
    %4 = arith.cmpi ne, %3, %c0_i32_0 : i32
    scf.if %4 {
      %cst = arith.constant 0.000000e+00 : f32
      %8 = vector.broadcast %cst : f32 to vector<8x128xf32>
      %c0 = arith.constant 0 : index
      %c0_2 = arith.constant 0 : index
      %c0_3 = arith.constant 0 : index
      %9 = vector.load %arg5[%c0, %c0_2, %c0_3] : memref<1x8x128xf32, #tpu.memory_space<vmem>>, vector<1x8x128xf32>
      %10 = vector.shape_cast %9 : vector<1x8x128xf32> to vector<8x128xf32>
      %11 = vector.shape_cast %8 : vector<8x128xf32> to vector<1x8x128xf32>
      tpu.vector_store %arg5[%c0, %c0_2, %c0_3], %11 {strides = array<i32>} : memref<1x8x128xf32, #tpu.memory_space<vmem>>, vector<1x8x128xf32>,
    } else {
    }
    %c2_i32 = arith.constant 2 : i32
    %5 = arith.cmpi slt, %1, %c2_i32 : i32
    %6 = arith.extui %5 : i1 to i32
    %c0_i32_1 = arith.constant 0 : i32
    %7 = arith.cmpi ne, %6, %c0_i32_1 : i32
    scf.if %7 {
      %c0 = arith.constant 0 : index
      %c0_2 = arith.constant 0 : index
      %c0_3 = arith.constant 0 : index
      %8 = vector.load %arg5[%c0, %c0_2, %c0_3] : memref<1x8x128xf32, #tpu.memory_space<vmem>>, vector<1x8x128xf32>
      %9 = vector.shape_cast %8 : vector<1x8x128xf32> to vector<8x128xf32>
      %c0_4 = arith.constant 0 : index
      %c0_5 = arith.constant 0 : index
      %10 = vector.load %arg2[%c0_4, %c0_5] : memref<8x128xf32, #tpu.memory_space<vmem>>, vector<8x128xf32>
      %c0_6 = arith.constant 0 : index
      %c0_7 = arith.constant 0 : index
      %11 = vector.load %arg3[%c0_6, %c0_7] : memref<8x128xf32, #tpu.memory_space<vmem>>, vector<8x128xf32>
      %12 = arith.subf %10, %11 : vector<8x128xf32>
      %c0_8 = arith.constant 0 : index
      %c0_9 = arith.constant 0 : index
      %13 = vector.load %arg4[%c0_8, %c0_9] : memref<8x128xf32, #tpu.memory_space<vmem>>, vector<8x128xf32>
      %14 = arith.mulf %13, %12 : vector<8x128xf32>
      %15 = arith.mulf %14, %14 : vector<8x128xf32>
      %16 = vector.shape_cast %15 : vector<8x128xf32> to vector<1x8x128xf32>
      %cst = arith.constant dense<0.000000e+00> : vector<8x128xf32>
      %17 = vector.multi_reduction <add>, %16, %cst [0] : vector<1x8x128xf32> to vector<8x128xf32>
      %18 = arith.addf %9, %17 : vector<8x128xf32>
      %c0_10 = arith.constant 0 : index
      %c0_11 = arith.constant 0 : index
      %c0_12 = arith.constant 0 : index
      %19 = vector.load %arg5[%c0_10, %c0_11, %c0_12] : memref<1x8x128xf32, #tpu.memory_space<vmem>>, vector<1x8x128xf32>
      %20 = vector.shape_cast %19 : vector<1x8x128xf32> to vector<8x128xf32>
      %21 = vector.shape_cast %18 : vector<8x128xf32> to vector<1x8x128xf32>
      tpu.vector_store %arg5[%c0_10, %c0_11, %c0_12], %21 {strides = array<i32>} : memref<1x8x128xf32, #tpu.memory_space<vmem>>, vector<1x8x128xf32>,
    } else {
    }
    return
  }
  func.func @transform_0(%arg0: i32, %arg1: i32) -> (i32, i32) {
    %c1_i32 = arith.constant 1 : i32
    %0 = arith.muli %arg0, %c1_i32 : i32
    %1 = arith.addi %0, %arg1 : i32
    %c1_i32_0 = arith.constant 1 : i32
    %2 = arith.minsi %1, %c1_i32_0 : i32
    %c0_i32 = arith.constant 0 : i32
    %c0_i32_1 = arith.constant 0 : i32
    return %2, %c0_i32 : i32, i32
  }
  func.func @transform_1(%arg0: i32, %arg1: i32) -> (i32, i32) {
    %c1_i32 = arith.constant 1 : i32
    %0 = arith.muli %arg0, %c1_i32 : i32
    %1 = arith.addi %0, %arg1 : i32
    %c1_i32_0 = arith.constant 1 : i32
    %2 = arith.minsi %1, %c1_i32_0 : i32
    %c0_i32 = arith.constant 0 : i32
    %c0_i32_1 = arith.constant 0 : i32
    return %2, %c0_i32 : i32, i32
  }
  func.func @transform_2(%arg0: i32, %arg1: i32) -> (i32, i32) {
    %c1_i32 = arith.constant 1 : i32
    %0 = arith.muli %arg0, %c1_i32 : i32
    %1 = arith.addi %0, %arg1 : i32
    %c1_i32_0 = arith.constant 1 : i32
    %2 = arith.minsi %1, %c1_i32_0 : i32
    %c0_i32 = arith.constant 0 : i32
    %c0_i32_1 = arith.constant 0 : i32
    return %2, %c0_i32 : i32, i32
  }
  func.func @transform_3(%arg0: i32, %arg1: i32) -> (i32, i32, i32) {
    %c0_i32 = arith.constant 0 : i32
    %c0_i32_0 = arith.constant 0 : i32
    %c0_i32_1 = arith.constant 0 : i32
    return %arg0, %c0_i32, %c0_i32_0 : i32, i32, i32
  }
}

</mosaic_0001>

<bundles_post_ra>
// kernel: tpu_custom_call.1
= control target key start
LH: loop header
LB: loop body
LE: loop exit
PB: predicated region body
PF: predicated region fallthrough
CT: control target
= control target key end

     0   :  { %s1077_s0 = inlined_call_operand.hbm [shape: f32[16,128], index: 0, kind: input, shape index: {}]   ;;  %s1078_s1 = inlined_call_operand.hbm [shape: f32[16,128], index: 1, kind: input, shape index: {}]   ;;  %s1079_s2 = inlined_call_operand.hbm [shape: f32[16,128], index: 2, kind: input, shape index: {}]   ;;  %s1080_s3 = inlined_call_operand.hbm [shape: f32[2,8,128], index: 3, kind: output, shape index: {}]  }
   0x1   :  { %1089 = sst [smem:[#allocation17_spill]] %s1078_s1 }
   0x2   :  { %8 = vsyncpa [#allocation3], 0 }
   0x3   :  { %10 = vsyncpa [#allocation3 + $0x1], 0 }
   0x4   :  { %11 = vsyncpa [#allocation6], 0 }
   0x5   :  { %13 = vsyncpa [#allocation6 + $0x1], 0 }
   0x6   :  { %14 = vsyncpa [#allocation4], 0 }
   0x7   :  { %16 = vsyncpa [#allocation4 + $0x1], 0  ;;  %s804_s12 = smov 0   ;;  %s806_s13 = smov 0  }
   0x8   :  { %s808_s14 = smov 0   ;;  %s810_s15 = smov 0  }
   0x9   :  { %s812_s16 = smov 0   ;;  %s814_s17 = smov 0  }
   0xa   :  { %s816_s18 = smov 0   ;;  %s818_s19 = smov 0  }
   0xb   :  { %s820_s20 = smov 0  }
   0xc LB: > { %1090 = sst [smem:[#allocation12_spill]] %s765_s17  ;;  %s848_s21 = sadd.s32 4294967295, %s777_s20   ;;  %s777_s20 = sphi %s820_s20, %s22_s20   ;;  %s773_s19 = sphi %s818_s19, %s1116_s19   ;;  %s769_s18 = sphi %s816_s18, %s1115_s18   ;;  %s765_s17 = sphi %s814_s17, %s1114_s17   ;;  %s761_s16 = sphi %s812_s16, %s1121_s16   ;;  %s757_s15 = sphi %s810_s15, %s1120_s15   ;;  %s753_s14 = sphi %s808_s14, %s1119_s14   ;;  %s749_s13 = sphi %s806_s13, %s1118_s13   ;;  %s745_s12 = sphi %s804_s12, %s1117_s12  }
   0xd   : > { %1091 = sst [smem:[#allocation13_spill]] %s773_s19  ;;  %s461_s22 = sadd.s32 4294967294, %s777_s20  }
   0xe   : > { %s34_s23 = sadd.s32 1, %s773_s19  ;;  %p39_p0 = scmp.lt.s32.totalorder %s773_s19, 1 }
   0xf   : > { %p36_p1 = scmp.ge.s32.totalorder %s34_s23, 2  ;;  %s47_s24 = sadd.s32 1, %s765_s17 }
  0x10   : > { %s40_s25 = scalar_select %p39_p0, %s773_s19, 1 }
  0x11   : > { %s1123_s23 = smov (%p36_p1, %s34_s23), 0  ;;  %p54_p2 = scmp.ne.s32.totalorder %s765_s17, %s761_s16 }
  0x12   : > { %1092 = sst [smem:[#allocation14_spill]] %s1123_s23  ;;  %p55_p3 = scmp.eq.s32.totalorder %s777_s20, 0 }
  0x13   : > { %p42_p4 = scmp.lt.s32.totalorder %s1123_s23, 1  ;;  %p60_p5 = scmp.ne.s32.totalorder %s761_s16, %s757_s15 }
  0x14   : > { %p862_p6 = por %p55_p3, %p54_p2  ;;  %p61_p7 = scmp.eq.s32.totalorder %s848_s21, 0 }
  0x15   : > { %s43_s27 = scalar_select %p42_p4, %s1123_s23, 1 }
  0x16   : > { %p868_p8 = por %p61_p7, %p60_p5  ;;  %s134_s29 = ssub.s32 %s773_s19, %s1123_s23 }
  0x17   : > { %s44_s30 = ssub.s32 %s40_s25, %s43_s27  ;;  %p135_p9 = scmp.eq.s32.totalorder %s134_s29, 0 }
  0x18   : > { %s1094_s28 = scalar_select %p868_p8, 1, 0 }
  0x19   : > { %p45_p10 = scmp.eq.s32.totalorder %s44_s30, 0  ;;  %s137_s4 = sadd.s32 1, %s753_s14 }
  0x1a   : > { %s876_s5 = scalar_select %p135_p9, %s753_s14, %s137_s4  }
  0x1b   : > { %s879_s6 = scalar_select %p45_p10, %s765_s17, %s47_s24  }
  0x1c   : > { %1095 = sst [smem:[#allocation15_spill]] %s876_s5  ;;  %p147_p11 = scmp.ne.s32.totalorder %s753_s14, %s749_s13 }
  0x1d   : > { %1096 = sst [smem:[#allocation16_spill]] %s879_s6  ;;  %p148_p12 = scmp.eq.s32.totalorder %s848_s21, 1 }
  0x1e   : > { %p153_p13 = scmp.ne.s32.totalorder %s749_s13, %s745_s12  ;;  %p154_p0 = scmp.eq.s32.totalorder %s461_s22, 1 }
  0x1f   : > { %p886_p1 = por %p148_p12, %p147_p11  ;;  %p502_p4 = scmp.lt.s32.totalorder %s777_s20, 2 }
  0x20   : > { %p891_p3 = por %p154_p0, %p153_p13  ;;  %s1081_s9 = sand.u32 1, %s765_s17  }
  0x21   : > { %s1097_s7 = scalar_select %p886_p1, 1, 0 }
  0x22   : > { %s1098_s8 = scalar_select %p891_p3, 1, 0 }
  0x23   : > { %s897_s10 = sshll.u32 %s40_s25, 7  ;;  %s901_s11 = sshll.u32 %s1081_s9, 3 }
  0x24   : > { %p905_p5 = pnand %p502_p4, %p862_p6  ;;  %s195_s22 = sand.u32 1, %s777_s20  }
  0x25   : > { %s1100_s1 = sld [smem:[#allocation17_spill]]  ;;  %s199_s25 = scalar_lea.vmem [#allocation5], %s901_s11 }
  0x26   : > { %s1099_s15 = scalar_select %p905_p5, 1, 0 }
  0x27   : > { %s209_s30 = sshll.u32 %s199_s25, 4  ;;  %s920_s26 = scalar_lea.sflag [#allocation6], %s195_s22  ;;  %s917_s30 = int_to_ptr.vmem [resolvable:$true] %s209_s30 }
  0x28   : > { %p926_p9 = pneg %p905_p5 }
  0x2b   : > { %s914_s29 = scalar_lea.hbm %s1100_s1, %s897_s10  ;;  %s582_s25 = scalar_lea.hbm %s1100_s1, 256 }
  0x2c   : > { %s577_s4 = scalar_lea.hbm %s914_s29, 128  ;;  %p583_p12 = scmp.lt.u32.totalorder %s914_s29, %s1100_s1 }
  0x2d   : > { %p578_p6 = scmp.ne.s32.totalorder %s914_s29, %s577_s4  ;;  %p584_p13 = scmp.lt.u32.totalorder %s582_s25, %s577_s4 }
  0x2e   : > { %p586_p4 = scmp.lt.u32.totalorder %s577_s4, %s914_s29 }
  0x2f   : > { %p580_p10 = pnand %p926_p9, %p578_p6  ;;  %p585_p0 = por %p584_p13, %p583_p12 }
  0x31   : > { %p581_p11 = pneg %p580_p10  ;;  %p587_p2 = por %p586_p4, %p585_p0 }
  0x33   : > { %p588_p7 = pnand %p587_p2, %p581_p11 }
  0x35   : > { %591 = shalt.err (!%p588_p7)
}
  0x36   : > { %s592_s22 = scalar_lea.vmem %s917_s30, 128  ;;  %s779_s24 = smov [#allocation5]  }
  0x37   : > { %p593_p6 = scmp.ne.s32.totalorder %s917_s30, %s592_s22  ;;  %s597_s27 = sshll.u32 %s779_s24, 4  ;;  %s598_s27 = int_to_ptr.vmem [resolvable:$false] %s597_s27 }
  0x38   : > { %s599_s19 = scalar_lea.vmem %s598_s27, 256  ;;  %p600_p1 = scmp.lt.s32.totalorder %s917_s30, %s598_s27 }
  0x39   : > { %p595_p10 = pnand %p593_p6, %p926_p9  ;;  %p601_p8 = scmp.lt.s32.totalorder %s599_s19, %s592_s22 }
  0x3b   : > { %p596_p3 = pneg %p595_p10  ;;  %p602_p12 = por %p601_p8, %p600_p1 }
  0x3d   : > { %p603_p13 = pnand %p602_p12, %p596_p3 }
  0x3f   : > { %606 = shalt.err (!%p603_p13)
}
  0x40   : > { %494 = dma.hbm_to_vmem [thread:$0]  (!%p905_p5), %s914_s29, 128, %s917_s30, %s920_s26  }
  0x41   : > { %p235_p2 = scmp.lt.s32.totalorder %s777_s20, 3  ;;  %p1102_p7 = scmp.ge.s32.totalorder %s777_s20, 1 }
  0x42   : > { %s961_s22 = scalar_lea.hbm %s1077_s0, %s897_s10  ;;  %s178_s24 = scalar_lea.vmem [#allocation2], %s901_s11 }
  0x43   : > { %p953_p11 = pnand %p1102_p7, %p235_p2  ;;  %s188_s27 = sshll.u32 %s178_s24, 4  ;;  %s189_s27 = int_to_ptr.vmem [resolvable:$true] %s188_s27 }
  0x44   : > { %s1104_s19 = sand.u32 1, %s765_s17   ;;  %s607_s30 = scalar_lea.hbm %s961_s22, 128 }
  0x45   : > { %s1103_s23 = scalar_select %p953_p11, 1, 0 }
  0x46   : > { %s175_s29 = scalar_lea.sflag [#allocation3], %s1104_s19  ;;  %p608_p8 = scmp.ne.s32.totalorder %s961_s22, %s607_s30 }
  0x47   : > { %s612_s4 = scalar_lea.hbm %s1077_s0, 256  ;;  %p613_p0 = scmp.lt.u32.totalorder %s961_s22, %s1077_s0 }
  0x48   : > { %p610_p1 = pnand %p608_p8, %p926_p9  ;;  %p614_p4 = scmp.lt.u32.totalorder %s612_s4, %s607_s30 }
  0x49   : > { %p616_p10 = scmp.lt.u32.totalorder %s607_s30, %s961_s22 }
  0x4a   : > { %p611_p3 = pneg %p610_p1  ;;  %p615_p6 = por %p614_p4, %p613_p0 }
  0x4c   : > { %p617_p12 = por %p616_p10, %p615_p6 }
  0x4e   : > { %p618_p13 = pnand %p617_p12, %p611_p3 }
  0x50   : > { %621 = shalt.err (!%p618_p13)
}
  0x51   : > { %s622_s24 = scalar_lea.vmem %s189_s27, 128  ;;  %s780_s19 = smov [#allocation2]  }
  0x52   : > { %p623_p2 = scmp.ne.s32.totalorder %s189_s27, %s622_s24  ;;  %s627_s17 = sshll.u32 %s780_s19, 4  ;;  %s628_s17 = int_to_ptr.vmem [resolvable:$false] %s627_s17 }
  0x53   : > { %s629_s1 = scalar_lea.vmem %s628_s17, 256  ;;  %p630_p1 = scmp.lt.s32.totalorder %s189_s27, %s628_s17 }
  0x54   : > { %p625_p7 = pnand %p623_p2, %p926_p9  ;;  %p631_p11 = scmp.lt.s32.totalorder %s629_s1, %s622_s24 }
  0x56   : > { %p626_p8 = pneg %p625_p7  ;;  %p632_p5 = por %p631_p11, %p630_p1 }
  0x58   : > { %p633_p0 = pnand %p632_p5, %p626_p8 }
  0x5a   : > { %636 = shalt.err (!%p633_p0)
}
  0x5b   : > { %p1105_p4 = scmp.ne.s32.totalorder %s1099_s15, 0  ;;  %s987_s30 = scalar_lea.hbm %s1079_s2, %s897_s10 }
  0x5c   : > { %s220_s17 = scalar_lea.vmem [#allocation7], %s901_s11  ;;  %s637_s25 = scalar_lea.hbm %s987_s30, 128 }
  0x5d   : > { %491 = dma.hbm_to_vmem [thread:$0]  (!%p1105_p4), %s961_s22, 128, %s189_s27, %s175_s29  }
  0x5e   : > { %s230_s4 = sshll.u32 %s220_s17, 4  ;;  %p638_p5 = scmp.ne.s32.totalorder %s987_s30, %s637_s25  ;;  %s231_s4 = int_to_ptr.vmem [resolvable:$true] %s230_s4 }
  0x5f   : > { %s642_s22 = scalar_lea.hbm %s1079_s2, 256  ;;  %p643_p6 = scmp.lt.u32.totalorder %s987_s30, %s1079_s2 }
  0x60   : > { %p640_p11 = pnand %p638_p5, %p926_p9  ;;  %p644_p10 = scmp.lt.u32.totalorder %s642_s22, %s637_s25 }
  0x61   : > { %p646_p13 = scmp.lt.u32.totalorder %s637_s25, %s987_s30 }
  0x62   : > { %p641_p3 = pneg %p640_p11  ;;  %p645_p12 = por %p644_p10, %p643_p6 }
  0x64   : > { %p647_p2 = por %p646_p13, %p645_p12 }
  0x66   : > { %p648_p7 = pnand %p647_p2, %p641_p3 }
  0x68   : > { %651 = shalt.err (!%p648_p7)
}
  0x69   : > { %s652_s10 = scalar_lea.vmem %s231_s4, 128  ;;  %s781_s11 = smov [#allocation7]  }
  0x6a   : > { %p653_p8 = scmp.ne.s32.totalorder %s231_s4, %s652_s10  ;;  %s657_s1 = sshll.u32 %s781_s11, 4  ;;  %s658_s1 = int_to_ptr.vmem [resolvable:$false] %s657_s1 }
  0x6b   : > { %s659_s5 = scalar_lea.vmem %s658_s1, 256  ;;  %p660_p5 = scmp.lt.s32.totalorder %s231_s4, %s658_s1 }
  0x6c   : > { %p655_p1 = pnand %p653_p8, %p926_p9  ;;  %p661_p11 = scmp.lt.s32.totalorder %s659_s5, %s652_s10 }
  0x6e   : > { %p656_p0 = pneg %p655_p1  ;;  %p662_p4 = por %p661_p11, %p660_p5 }
  0x70   : > { %p663_p6 = pnand %p662_p4, %p656_p0 }
  0x72   : > { %666 = shalt.err (!%p663_p6)
}
  0x73   : > { %p1106_p10 = scmp.ne.s32.totalorder %s1099_s15, 0  ;;  %p1107_p3 = scmp.ne.s32.totalorder %s1103_s23, 0 }
  0x74   : > { %s241_s9 = sand.u32 (!%p1107_p3), 1, %s761_s16   ;;  %p1108_p9 = scmp.ne.s32.totalorder (!%p1107_p3), %s1094_s28, 0 }
  0x75   : > { %497 = dma.hbm_to_vmem [thread:$0]  (!%p1106_p10), %s987_s30, 128, %s231_s4, %s920_s26  }
  0x76   : > { %239 = sbr.rel (%p1107_p3) target bundleno = 168 (0xa8), region = 32  ;;  %s471_s6 = sshll.u32 (!%p1107_p3), %s241_s9, 3 }
  0x77   : > { %s242_s17 = scalar_lea.sflag (!%p1107_p3), [#allocation3], %s241_s9  ;;  %s245_s25 = scalar_lea.vmem (!%p1107_p3), [#allocation2], %s471_s6 }
  0x7d   : > { %732 = dma.done.wait (%p1108_p9), %s242_s17, 128  }
  0x7e   : > { %734 = vsyncadd (%p1108_p9), %s242_s17, 4294967168  ;;  %s250_s15 = sand.u32 1, %s848_s21   ;;  %s254_s19 = scalar_lea.vmem [#allocation5], %s471_s6 }
  0x7f   : > { %s251_s24 = scalar_lea.sflag [#allocation6], %s250_s15 }
  0x80   : > { %736 = dma.done.wait (%p1108_p9), %s251_s24, 256  }
  0x81   : > { %738 = vsyncadd (%p1108_p9), %s251_s24, 4294967040  ;;  %s293_s26 = sand.u32 1, %s749_s13   ;;  %v782_v0 = vmov 0.0   ;;  %s263_s4 = scalar_lea.vmem [#allocation7], %s471_s6 }
  0x82   : > { %s474_s23 = sshll.u32 %s293_s26, 3  ;;  %p475_p4 = scmp.ge.s32.totalorder %s769_s18, 2 }
  0x83   : > { %s295_s30 = scalar_lea.vmem [#allocation8], %s474_s23  ;;  %v316_v1 = vld [vmem:[%s245_s25] sm:$0xff] (!%p475_p4)  ;;  %v317_v2 = vld [vmem:[%s254_s19] sm:$0xff] (!%p475_p4) }
  0x84   : > { %310 = vst [vmem:[%s295_s30] sm:$0xff] %v782_v0  ;;  %314 = sbr.rel (%p475_p4) target bundleno = 143 (0x8f), region = 52  ;;  %v318_v3 = vsub.f32 (!%p475_p4), %v316_v1, %v317_v2  ;;  %v319_v4 = vld [vmem:[%s263_s4] sm:$0xff] (!%p475_p4) }
  0x86   : > { %v320_v5 = vmul.f32 (!%p475_p4), %v319_v4, %v318_v3 }
  0x88   : > { %v321_v7 = vmul.f32 (!%p475_p4), %v320_v5, %v320_v5 }
  0x8b   : > { %v315_v6 = vld [vmem:[%s295_s30] sm:$0xff] }
  0x8c   : > { %v323_v8 = vadd.f32 %v321_v7, %v315_v6 }
  0x8e   : > { %324 = vst [vmem:[%s295_s30] sm:$0xff] %v323_v8 }
  0x8f PF: > { %s477_s21 = sshll.u32 %s769_s18, 7  ;;  %s339_s29 = sshll.u32 %s295_s30, 4  ;;  %s340_s29 = int_to_ptr.vmem [resolvable:$true] %s339_s29 }
  0x90   : > { %s1026_s27 = scalar_lea.hbm %s1080_s3, %s477_s21  ;;  %s326_s10 = scalar_lea.sflag [#allocation4], %s293_s26 }
  0x91   : > { %s667_s11 = scalar_lea.vmem %s340_s29, 128  ;;  %p1109_p13 = scmp.ne.s32.totalorder %s1097_s7, 0 }
  0x92   : > { %p668_p12 = scmp.ne.s32.totalorder %s340_s29, %s667_s11  ;;  %s783_s1 = smov [#allocation8]  }
  0x93   : > { %s671_s5 = sshll.u32 %s783_s1, 4  ;;  %s672_s5 = int_to_ptr.vmem [resolvable:$false] %s671_s5 }
  0x94   : > { %p669_p2 = pnand %p668_p12, %p1109_p13  ;;  %s673_s9 = scalar_lea.vmem %s672_s5, 256 }
  0x95   : > { %p674_p8 = scmp.lt.s32.totalorder %s340_s29, %s672_s5  ;;  %p675_p1 = scmp.lt.s32.totalorder %s673_s9, %s667_s11 }
  0x96   : > { %p670_p7 = pneg %p669_p2 }
  0x97   : > { %p676_p0 = por %p675_p1, %p674_p8 }
  0x99   : > { %p677_p5 = pnand %p676_p0, %p670_p7 }
  0x9b   : > { %680 = shalt.err (!%p677_p5)
}
  0x9c   : > { %s681_s18 = scalar_lea.hbm %s1026_s27, 128  ;;  %s685_s25 = scalar_lea.hbm %s1080_s3, 256 }
  0x9d   : > { %p682_p11 = scmp.ne.s32.totalorder %s1026_s27, %s681_s18  ;;  %p686_p3 = scmp.lt.u32.totalorder %s1026_s27, %s1080_s3 }
  0x9e   : > { %p687_p9 = scmp.lt.u32.totalorder %s685_s25, %s681_s18  ;;  %p689_p12 = scmp.lt.u32.totalorder %s681_s18, %s1026_s27 }
  0x9f   : > { %p683_p6 = pnand %p682_p11, %p1109_p13 }
  0xa0   : > { %p688_p4 = por %p687_p9, %p686_p3 }
  0xa1   : > { %p684_p10 = pneg %p683_p6 }
  0xa2   : > { %p690_p2 = por %p689_p12, %p688_p4 }
  0xa4   : > { %p691_p7 = pnand %p690_p2, %p684_p10 }
  0xa6   : > { %694 = shalt.err (!%p691_p7)
}
  0xa7   : > { %486 = dma.vmem_to_hbm [thread:$0]  (%p1109_p13), %s340_s29, 128, %s1026_s27, %s326_s10  }
  0xa8 PF: > { %s351_s19 = sand.u32 1, %s745_s12   ;;  %p1110_p8 = scmp.ne.s32.totalorder %s1098_s8, 0 }
  0xa9   : > { %p1111_p1 = scmp.ge.s32.totalorder %s777_s20, 2  ;;  %s352_s26 = scalar_lea.sflag [#allocation4], %s351_s19 }
  0xab   : > { %p499_p0 = pnand %p1111_p1, %p1110_p8 }
  0xad   : > { %740 = dma.done.wait (!%p499_p0), %s352_s26, 128  }
  0xae   : > { %742 = vsyncadd (!%p499_p0), %s352_s26, 4294967168  ;;  %s22_s20 = sadd.s32 1, %s777_s20   ;;  %s1112_s23 = sld [smem:[#allocation15_spill]] }
  0xaf   : > { %p19_p5 = scmp.ge.s32.totalorder %s22_s20, 4   ;;  %s1113_s7 = sld [smem:[#allocation12_spill]] }
  0xb0   : > { %s1114_s17 = sld [smem:[#allocation16_spill]]  ;;  %s1115_s18 = sld [smem:[#allocation13_spill]] }
  0xb1   : > { %s1116_s19 = sld [smem:[#allocation14_spill]]  ;;  %s1117_s12 = smov %s749_s13 }
  0xb2   : > { %s1118_s13 = smov %s753_s14  ;;  %s1120_s15 = smov %s761_s16 }
  0xb3   :  { %21 = sbr.rel (!%p19_p5) target bundleno = 12 (0xc), region = 109 }
  0xb4   : > { %s1119_s14 = smov %s1112_s23 }
  0xb5   : > { %s1121_s16 = smov %s1113_s7 }
  0xba   :  { %357 = vsyncpa [#allocation3], 1 }
  0xbb   :  { %359 = vsyncpa [#allocation3 + $0x1], 1 }
  0xbc   :  { %360 = vsyncpa [#allocation6], 1 }
  0xbd   :  { %362 = vsyncpa [#allocation6 + $0x1], 1 }
  0xbe   :  { %363 = vsyncpa [#allocation4], 1 }
  0xbf   :  { %365 = vsyncpa [#allocation4 + $0x1], 1 }

</bundles_post_ra>
